<compile_context>
chip_gen: v7x
topology: tpu7x:2x2x1
jax: 0.10.0
libtpu: 0.0.40
codegen_flags: <defaults>
</compile_context>

<pallas_src>
import functools

import jax
import jax.numpy as jnp
from jax.experimental import pallas as pl
from jax.experimental.pallas import tpu as pltpu


# ---------------------------------------------------------------------------
# Kernel
# ---------------------------------------------------------------------------
def _vae_kernel(x_ref, mask_ref,
                w1_ref, b1_ref,
                wml_ref, bml_ref,     # fused (H, 2L) mu|log_var weight (f32), (1, 2L) bias
                w3_ref, b3_ref,
                w4_ref, b4_ref,
                eps_ref,
                fused_ref):
    """One row tile (r_elems batch elements * input_dim rows) per grid step.

    fused_ref layout (lane-dense, padded to a multiple of 128):
        [:, 0:D]        recon (sigmoid output)
        [:, D:2D]       masked_flattened
        [:, 2D:2D+2L]   mu | log_var (fused encoder head)
        [:, 2D+2L:]     zero padding
    """
    D = x_ref.shape[-1]
    L = eps_ref.shape[-1]
    bf16 = jnp.bfloat16
    f32 = jnp.float32

    # ---- mask (mask tile was pre-broadcast once, outside the forward path) ----
    masked = x_ref[...] * mask_ref[...]

    # ---- encode: fc1 (bf16 in, f32 acc) + relu ----
    h1 = jnp.dot(masked.astype(bf16), w1_ref[...],
                 preferred_element_type=f32) + b1_ref[...]
    h1 = jnp.maximum(h1, 0.0)

    # ---- fused encoder head (fc_mu | fc_log_var), kept in f32: tiny matmul,
    #      avoids bf16 rounding being amplified through exp(0.5*log_var) ----
    mulv = jnp.dot(h1, wml_ref[...], preferred_element_type=f32) + bml_ref[...]
    mu = mulv[:, :L]
    log_var = mulv[:, L:]

    # ---- reparameterize (eps supplied from outside, matching randn_like) ----
    std = jnp.exp(0.5 * log_var)
    z = mu + eps_ref[...] * std

    # ---- decode: fc3 + relu, fc4 + sigmoid ----
    h3 = jnp.dot(z.astype(bf16), w3_ref[...],
                 preferred_element_type=f32) + b3_ref[...]
    h3 = jnp.maximum(h3, 0.0)
    logits = jnp.dot(h3.astype(bf16), w4_ref[...],
                     preferred_element_type=f32) + b4_ref[...]
    recon = jax.nn.sigmoid(logits)

    # ---- single fused, lane-dense output slab (one writeback stream) ----
    fused_ref[:, 0:D] = recon
    fused_ref[:, D:2 * D] = masked
    fused_ref[:, 2 * D:2 * D + 2 * L] = mulv
    pad = fused_ref.shape[-1] - (2 * D + 2 * L)
    if pad > 0:  # static
        fused_ref[:, 2 * D + 2 * L:] = jnp.zeros((fused_ref.shape[0], pad), f32)


# ---------------------------------------------------------------------------
# One-time prep (hoisted out of the forward path)
# ---------------------------------------------------------------------------
def _chip_budget():
    """(target_rows, vmem_limit_bytes) sized per TPU generation."""
    vmem_bytes = None
    try:
        vmem_bytes = getattr(pltpu.get_tpu_info(), "vmem_capacity_bytes", None)
    except Exception:
        vmem_bytes = None
    if vmem_bytes is None:
        vmem_bytes = 64 * 1024 * 1024            # conservative (v7x-sized)
    if vmem_bytes >= 100 * 1024 * 1024:          # v5e / v6e: 128 MiB VMEM
        return 1024, 96 * 1024 * 1024
    return 512, 48 * 1024 * 1024                 # v7x: 64 MiB VMEM, keep headroom


def prepare_params(params, batch_size, target_rows=None):
    """Per-(params, batch_size) prep done ONCE: fused/bf16 weights, pre-broadcast
    mask tile, tiling metadata.  The per-call forward is then a single pallas_call."""
    mask = params["mask"]
    D = mask.shape[0]                  # input_dim
    H = params["w1"].shape[1]          # hidden_dim
    L = params["wmu"].shape[1]         # latent_dim
    assert D % 8 == 0, "input_dim must be a multiple of 8 for TPU sublane tiling"

    chip_rows, vmem_limit = _chip_budget()
    if target_rows is None:
        target_rows = chip_rows

    # rows per grid step: ~target_rows, but keep >= 2 grid tiles when the batch
    # allows it so v7x's two TensorCores both get work on the "parallel" axis.
    B = batch_size
    want = max(1, target_rows // D)
    if B >= 2:
        want = min(want, B // 2)
    want = max(1, min(want, B))
    r_elems = 1
    for r in range(want, 0, -1):
        if B % r == 0:
            r_elems = r
            break
    tile_rows = r_elems * D
    n_tiles = B // r_elems

    w_used = 2 * D + 2 * L
    w_pad = ((w_used + 127) // 128) * 128        # lane-dense fused output width

    bf16 = jnp.bfloat16
    return {
        "w1": params["w1"].astype(bf16),
        "b1": params["b1"],
        "wml": jnp.concatenate([params["wmu"], params["wlv"]], axis=1),  # f32 head
        "bml": jnp.concatenate([params["bmu"], params["blv"]], axis=1),
        "w3": params["w3"].astype(bf16),
        "b3": params["b3"],
        "w4": params["w4"].astype(bf16),
        "b4": params["b4"],
        "mask_tile": jnp.tile(mask, (r_elems, 1)),          # (tile_rows, D)
        "meta": dict(D=D, H=H, L=L, B=B, r_elems=r_elems, n_tiles=n_tiles,
                     tile_rows=tile_rows, w_pad=w_pad, vmem_limit=vmem_limit),
    }


# ---------------------------------------------------------------------------
# Forward
# ---------------------------------------------------------------------------
def _rep_spec(shape, single_buffer):
    idx = lambda i: (0,) * len(shape)
    if single_buffer:
        return pl.BlockSpec(shape, idx, pipeline_mode=pl.Buffered(1))
    return pl.BlockSpec(shape, idx)


def _pallas_forward(x, eps, prep, single_buffer_weights):
    m = prep["meta"]
    D, H, L = m["D"], m["H"], m["L"]
    tile_rows, n_tiles, w_pad = m["tile_rows"], m["n_tiles"], m["w_pad"]
    N = x.shape[0]

    row_blk = lambda i: (i, 0)
    rs = functools.partial(_rep_spec, single_buffer=single_buffer_weights)

    in_specs = [
        pl.BlockSpec((tile_rows, D), row_blk),     # x (row stream)
        rs((tile_rows, D)),                        # mask tile (resident)
        rs((D, H)),                                # W1     (bf16)
        rs((1, H)),                                # b1     (f32)
        rs((H, 2 * L)),                            # Wmu|Wlv (f32)
        rs((1, 2 * L)),                            # bmu|blv (f32)
        rs((L, H)),                                # W3     (bf16)
        rs((1, H)),                                # b3     (f32)
        rs((H, D)),                                # W4     (bf16)
        rs((1, D)),                                # b4     (f32)
        pl.BlockSpec((tile_rows, L), row_blk),     # eps (row stream)
    ]
    out_specs = pl.BlockSpec((tile_rows, w_pad), row_blk)
    out_shape = jax.ShapeDtypeStruct((N, w_pad), jnp.float32)

    return pl.pallas_call(
        _vae_kernel,
        out_shape=out_shape,
        grid_spec=pltpu.PrefetchScalarGridSpec(
            num_scalar_prefetch=0,
            grid=(n_tiles,),
            in_specs=in_specs,
            out_specs=out_specs,
        ),
        compiler_params=pltpu.CompilerParams(
            dimension_semantics=("parallel",),
            vmem_limit_bytes=m["vmem_limit"],
        ),
    )(x, prep["mask_tile"],
      prep["w1"], prep["b1"],
      prep["wml"], prep["bml"],
      prep["w3"], prep["b3"],
      prep["w4"], prep["b4"],
      eps)


def masked_vae_forward(x, prep, eps):
    """x: [batch*input_dim, input_dim] f32, eps: [batch*input_dim, latent_dim] f32.
    Returns (recon, mu, log_var, masked_flattened) matching the PyTorch forward."""
    m = prep["meta"]
    D, L, B = m["D"], m["L"], m["B"]
    N, D_in = x.shape
    assert D_in == D and N == B * D

    try:
        fused = _pallas_forward(x, eps, prep, single_buffer_weights=True)
    except Exception:
        # pipeline_mode=pl.Buffered(1) not supported on this jax version:
        # fall back to default double-buffered grid-invariant operands.
        fused = _pallas_forward(x, eps, prep, single_buffer_weights=False)

    recon = fused[:, :D]
    masked = fused[:, D:2 * D]
    mu = fused[:, 2 * D:2 * D + L]
    log_var = fused[:, 2 * D + L:2 * D + 2 * L]
    return recon, mu, log_var, masked


# ---------------------------------------------------------------------------
# Params / reference
# ---------------------------------------------------------------------------
def init_params(key, input_dim, hidden_dim, latent_dim):
    """Deterministic init mirroring the module's parameter shapes.
    Linear weights are stored transposed: [in_features, out_features] (f32)."""
    def linear(k, fan_in, fan_out):
        kw, kb = jax.random.split(k)
        bound = 1.0 / jnp.sqrt(fan_in)
        w = jax.random.uniform(kw, (fan_in, fan_out), jnp.float32, -bound, bound)
        b = jax.random.uniform(kb, (1, fan_out), jnp.float32, -bound, bound)
        return w, b

    k1, k2, k3, k4, k5 = jax.random.split(key, 5)
    w1, b1 = linear(k1, input_dim, hidden_dim)
    wmu, bmu = linear(k2, hidden_dim, latent_dim)
    wlv, blv = linear(k3, hidden_dim, latent_dim)
    w3, b3 = linear(k4, latent_dim, hidden_dim)
    w4, b4 = linear(k5, hidden_dim, input_dim)
    mask = jnp.ones((input_dim, input_dim), jnp.float32)   # nn.Parameter(torch.ones(...))
    return dict(w1=w1, b1=b1, wmu=wmu, bmu=bmu, wlv=wlv, blv=blv,
                w3=w3, b3=b3, w4=w4, b4=b4, mask=mask)


def _reference_forward(x, params, eps):
    """Pure-JAX (f32) reference of the PyTorch forward, for verification."""
    D = params["mask"].shape[0]
    B = x.shape[0] // D
    masked = (x.reshape(B, D, D) * params["mask"][None]).reshape(B * D, D)
    h1 = jax.nn.relu(masked @ params["w1"] + params["b1"])
    mu = h1 @ params["wmu"] + params["bmu"]
    log_var = h1 @ params["wlv"] + params["blv"]
    z = mu + eps * jnp.exp(0.5 * log_var)
    h3 = jax.nn.relu(z @ params["w3"] + params["b3"])
    recon = jax.nn.sigmoid(h3 @ params["w4"] + params["b4"])
    return recon, mu, log_var, masked


if __name__ == "__main__":
    input_dim, hidden_dim, latent_dim = 16, 32, 8
    batch_size = 2

    key = jax.random.PRNGKey(0)
    k_params, k_x, k_eps = jax.random.split(key, 3)
    params = init_params(k_params, input_dim, hidden_dim, latent_dim)

    # one-time prep (fused/bf16 weights, mask tile, tiling) hoisted off the forward path
    prep = jax.tree_util.tree_map(
        lambda a: a, prepare_params(params, batch_size))

    # forward() expects x with leading dim batch_size * input_dim
    x = jax.random.normal(k_x, (batch_size * input_dim, input_dim), jnp.float32)
    # eps plays the role of torch.randn_like(std) in reparameterize
    # TODO(synk): torch.randn_like is generated host-side here; in-kernel
    # pltpu.prng_random_bits could replace it but changes RNG semantics.
    eps = jax.random.normal(k_eps, (batch_size * input_dim, latent_dim), jnp.float32)

    recon, mu, log_var, masked = jax.block_until_ready(
        masked_vae_forward(x, prep, eps))

    # sanity check against a pure-f32 JAX reference.
    # (fc1/fc3/fc4 use bf16 inputs with f32 accumulation -> relaxed tolerance)
    r_recon, r_mu, r_lv, r_masked = _reference_forward(x, params, eps)
    assert recon.shape == (batch_size * input_dim, input_dim)
    assert mu.shape == (batch_size * input_dim, latent_dim)
    assert log_var.shape == (batch_size * input_dim, latent_dim)
    assert masked.shape == (batch_size * input_dim, input_dim)
    # mask multiply is exact f32 in-kernel
    assert jnp.allclose(masked, r_masked, atol=1e-6, rtol=1e-6)
    for a, b in ((recon, r_recon), (mu, r_mu), (log_var, r_lv)):
        assert jnp.allclose(a, b, atol=2e-2, rtol=2e-2)

    print("KERNEL_OK")
</pallas_src>

<mosaic_0001>
module attributes {stable_mosaic.version = 11 : i64} {
  func.func @_vae_kernel(%arg0: i32, %arg1: memref<16x16xf32, #tpu.memory_space<vmem>>, %arg2: memref<16x16xf32, #tpu.memory_space<vmem>>, %arg3: memref<16x32xbf16, #tpu.memory_space<vmem>>, %arg4: memref<1x32xf32, #tpu.memory_space<vmem>>, %arg5: memref<32x16xf32, #tpu.memory_space<vmem>>, %arg6: memref<1x16xf32, #tpu.memory_space<vmem>>, %arg7: memref<8x32xbf16, #tpu.memory_space<vmem>>, %arg8: memref<1x32xf32, #tpu.memory_space<vmem>>, %arg9: memref<32x16xbf16, #tpu.memory_space<vmem>>, %arg10: memref<1x16xf32, #tpu.memory_space<vmem>>, %arg11: memref<16x8xf32, #tpu.memory_space<vmem>>, %arg12: memref<16x128xf32, #tpu.memory_space<vmem>>) attributes {dimension_semantics = [#tpu.dimension_semantics<parallel>], iteration_bounds = array<i64: 2>, scalar_prefetch = 0 : i64, scratch_operands = 0 : i64, tpu.core_type = #tpu.core_type<tc>, window_params = [{transform_indices = @transform_0, window_bounds = array<i64: 16, 16>}, {pipeline_mode = #tpu.pipeline_mode<synchronous>, transform_indices = @transform_1, window_bounds = array<i64: 16, 16>}, {pipeline_mode = #tpu.pipeline_mode<synchronous>, transform_indices = @transform_2, window_bounds = array<i64: 16, 32>}, {pipeline_mode = #tpu.pipeline_mode<synchronous>, transform_indices = @transform_3, window_bounds = array<i64: 1, 32>}, {pipeline_mode = #tpu.pipeline_mode<synchronous>, transform_indices = @transform_4, window_bounds = array<i64: 32, 16>}, {pipeline_mode = #tpu.pipeline_mode<synchronous>, transform_indices = @transform_5, window_bounds = array<i64: 1, 16>}, {pipeline_mode = #tpu.pipeline_mode<synchronous>, transform_indices = @transform_6, window_bounds = array<i64: 8, 32>}, {pipeline_mode = #tpu.pipeline_mode<synchronous>, transform_indices = @transform_7, window_bounds = array<i64: 1, 32>}, {pipeline_mode = #tpu.pipeline_mode<synchronous>, transform_indices = @transform_8, window_bounds = array<i64: 32, 16>}, {pipeline_mode = #tpu.pipeline_mode<synchronous>, transform_indices = @transform_9, window_bounds = array<i64: 1, 16>}, {transform_indices = @transform_10, window_bounds = array<i64: 16, 8>}, {transform_indices = @transform_11, window_bounds = array<i64: 16, 128>}]} {
    %c0 = arith.constant 0 : index
    %c0_0 = arith.constant 0 : index
    %0 = vector.load %arg1[%c0, %c0_0] : memref<16x16xf32, #tpu.memory_space<vmem>>, vector<16x16xf32>
    %c0_1 = arith.constant 0 : index
    %c0_2 = arith.constant 0 : index
    %1 = vector.load %arg2[%c0_1, %c0_2] : memref<16x16xf32, #tpu.memory_space<vmem>>, vector<16x16xf32>
    %2 = arith.mulf %0, %1 : vector<16x16xf32>
    %3 = arith.truncf %2 : vector<16x16xf32> to vector<16x16xbf16>
    %c0_3 = arith.constant 0 : index
    %c0_4 = arith.constant 0 : index
    %4 = vector.load %arg3[%c0_3, %c0_4] : memref<16x32xbf16, #tpu.memory_space<vmem>>, vector<16x32xbf16>
    %cst = arith.constant dense<0.000000e+00> : vector<16x32xf32>
    %5 = tpu.matmul %3, %4, %cst {dimension_numbers = #tpu.dot_dimension_numbers<[1], [0], [0], [1], [0, 0, 1, 1], [], []>} : vector<16x16xbf16>, vector<16x32xbf16>, vector<16x32xf32> -> vector<16x32xf32>
    %c0_5 = arith.constant 0 : index
    %c0_6 = arith.constant 0 : index
    %6 = vector.load %arg4[%c0_5, %c0_6] : memref<1x32xf32, #tpu.memory_space<vmem>>, vector<1x32xf32>
    %7 = vector.broadcast %6 : vector<1x32xf32> to vector<16x32xf32>
    %8 = arith.addf %5, %7 : vector<16x32xf32>
    %cst_7 = arith.constant 0.000000e+00 : f32
    %9 = vector.broadcast %cst_7 : f32 to vector<16x32xf32>
    %10 = arith.maximumf %8, %9 : vector<16x32xf32>
    %c0_8 = arith.constant 0 : index
    %c0_9 = arith.constant 0 : index
    %11 = vector.load %arg5[%c0_8, %c0_9] : memref<32x16xf32, #tpu.memory_space<vmem>>, vector<32x16xf32>
    %cst_10 = arith.constant dense<0.000000e+00> : vector<16x16xf32>
    %12 = tpu.matmul %10, %11, %cst_10 {dimension_numbers = #tpu.dot_dimension_numbers<[1], [0], [0], [1], [0, 0, 1, 1], [], []>} : vector<16x32xf32>, vector<32x16xf32>, vector<16x16xf32> -> vector<16x16xf32>
    %c0_11 = arith.constant 0 : index
    %c0_12 = arith.constant 0 : index
    %13 = vector.load %arg6[%c0_11, %c0_12] : memref<1x16xf32, #tpu.memory_space<vmem>>, vector<1x16xf32>
    %14 = vector.broadcast %13 : vector<1x16xf32> to vector<16x16xf32>
    %15 = arith.addf %12, %14 : vector<16x16xf32>
    %16 = vector.extract_strided_slice %15 {offsets = [0, 0], sizes = [16, 8], strides = [1, 1]} : vector<16x16xf32> to vector<16x8xf32>
    %17 = vector.extract_strided_slice %15 {offsets = [0, 8], sizes = [16, 8], strides = [1, 1]} : vector<16x16xf32> to vector<16x8xf32>
    %cst_13 = arith.constant 5.000000e-01 : f32
    %18 = vector.broadcast %cst_13 : f32 to vector<16x8xf32>
    %19 = arith.mulf %18, %17 : vector<16x8xf32>
    %20 = math.exp %19 : vector<16x8xf32>
    %c0_14 = arith.constant 0 : index
    %c0_15 = arith.constant 0 : index
    %21 = vector.load %arg11[%c0_14, %c0_15] : memref<16x8xf32, #tpu.memory_space<vmem>>, vector<16x8xf32>
    %22 = arith.mulf %21, %20 : vector<16x8xf32>
    %23 = arith.addf %16, %22 : vector<16x8xf32>
    %24 = arith.truncf %23 : vector<16x8xf32> to vector<16x8xbf16>
    %c0_16 = arith.constant 0 : index
    %c0_17 = arith.constant 0 : index
    %25 = vector.load %arg7[%c0_16, %c0_17] : memref<8x32xbf16, #tpu.memory_space<vmem>>, vector<8x32xbf16>
    %cst_18 = arith.constant dense<0.000000e+00> : vector<16x32xf32>
    %26 = tpu.matmul %24, %25, %cst_18 {dimension_numbers = #tpu.dot_dimension_numbers<[1], [0], [0], [1], [0, 0, 1, 1], [], []>} : vector<16x8xbf16>, vector<8x32xbf16>, vector<16x32xf32> -> vector<16x32xf32>
    %c0_19 = arith.constant 0 : index
    %c0_20 = arith.constant 0 : index
    %27 = vector.load %arg8[%c0_19, %c0_20] : memref<1x32xf32, #tpu.memory_space<vmem>>, vector<1x32xf32>
    %28 = vector.broadcast %27 : vector<1x32xf32> to vector<16x32xf32>
    %29 = arith.addf %26, %28 : vector<16x32xf32>
    %cst_21 = arith.constant 0.000000e+00 : f32
    %30 = vector.broadcast %cst_21 : f32 to vector<16x32xf32>
    %31 = arith.maximumf %29, %30 : vector<16x32xf32>
    %32 = arith.truncf %31 : vector<16x32xf32> to vector<16x32xbf16>
    %c0_22 = arith.constant 0 : index
    %c0_23 = arith.constant 0 : index
    %33 = vector.load %arg9[%c0_22, %c0_23] : memref<32x16xbf16, #tpu.memory_space<vmem>>, vector<32x16xbf16>
    %cst_24 = arith.constant dense<0.000000e+00> : vector<16x16xf32>
    %34 = tpu.matmul %32, %33, %cst_24 {dimension_numbers = #tpu.dot_dimension_numbers<[1], [0], [0], [1], [0, 0, 1, 1], [], []>} : vector<16x32xbf16>, vector<32x16xbf16>, vector<16x16xf32> -> vector<16x16xf32>
    %c0_25 = arith.constant 0 : index
    %c0_26 = arith.constant 0 : index
    %35 = vector.load %arg10[%c0_25, %c0_26] : memref<1x16xf32, #tpu.memory_space<vmem>>, vector<1x16xf32>
    %36 = vector.broadcast %35 : vector<1x16xf32> to vector<16x16xf32>
    %37 = arith.addf %34, %36 : vector<16x16xf32>
    %38 = arith.negf %37 : vector<16x16xf32>
    %39 = math.exp %38 : vector<16x16xf32>
    %cst_27 = arith.constant 1.000000e+00 : f32
    %40 = vector.broadcast %cst_27 : f32 to vector<16x16xf32>
    %41 = arith.addf %40, %39 : vector<16x16xf32>
    %42 = arith.divf %40, %41 : vector<16x16xf32>
    %c0_28 = arith.constant 0 : index
    %c0_29 = arith.constant 0 : index
    %43 = vector.load %arg12[%c0_28, %c0_29] : memref<16x128xf32, #tpu.memory_space<vmem>>, vector<16x16xf32>
    tpu.vector_store %arg12[%c0_28, %c0_29], %42 {strides = array<i32>} : memref<16x128xf32, #tpu.memory_space<vmem>>, vector<16x16xf32>,
    %c0_30 = arith.constant 0 : index
    %c16 = arith.constant 16 : index
    %44 = vector.load %arg12[%c0_30, %c16] : memref<16x128xf32, #tpu.memory_space<vmem>>, vector<16x16xf32>
    tpu.vector_store %arg12[%c0_30, %c16], %2 {strides = array<i32>} : memref<16x128xf32, #tpu.memory_space<vmem>>, vector<16x16xf32>,
    %c0_31 = arith.constant 0 : index
    %c32 = arith.constant 32 : index
    %45 = vector.load %arg12[%c0_31, %c32] : memref<16x128xf32, #tpu.memory_space<vmem>>, vector<16x16xf32>
    tpu.vector_store %arg12[%c0_31, %c32], %15 {strides = array<i32>} : memref<16x128xf32, #tpu.memory_space<vmem>>, vector<16x16xf32>,
    %cst_32 = arith.constant 0.000000e+00 : f32
    %46 = vector.broadcast %cst_32 : f32 to vector<16x80xf32>
    %c0_33 = arith.constant 0 : index
    %c48 = arith.constant 48 : index
    %47 = vector.load %arg12[%c0_33, %c48] : memref<16x128xf32, #tpu.memory_space<vmem>>, vector<16x80xf32>
    tpu.vector_store %arg12[%c0_33, %c48], %46 {strides = array<i32>} : memref<16x128xf32, #tpu.memory_space<vmem>>, vector<16x80xf32>,
    return
  }
  func.func @transform_0(%arg0: i32) -> (i32, i32) {
    %c0_i32 = arith.constant 0 : i32
    %c0_i32_0 = arith.constant 0 : i32
    return %arg0, %c0_i32 : i32, i32
  }
  func.func @transform_1(%arg0: i32) -> (i32, i32) {
    %c0_i32 = arith.constant 0 : i32
    %c0_i32_0 = arith.constant 0 : i32
    %c0_i32_1 = arith.constant 0 : i32
    return %c0_i32, %c0_i32_0 : i32, i32
  }
  func.func @transform_2(%arg0: i32) -> (i32, i32) {
    %c0_i32 = arith.constant 0 : i32
    %c0_i32_0 = arith.constant 0 : i32
    %c0_i32_1 = arith.constant 0 : i32
    return %c0_i32, %c0_i32_0 : i32, i32
  }
  func.func @transform_3(%arg0: i32) -> (i32, i32) {
    %c0_i32 = arith.constant 0 : i32
    %c0_i32_0 = arith.constant 0 : i32
    %c0_i32_1 = arith.constant 0 : i32
    return %c0_i32, %c0_i32_0 : i32, i32
  }
  func.func @transform_4(%arg0: i32) -> (i32, i32) {
    %c0_i32 = arith.constant 0 : i32
    %c0_i32_0 = arith.constant 0 : i32
    %c0_i32_1 = arith.constant 0 : i32
    return %c0_i32, %c0_i32_0 : i32, i32
  }
  func.func @transform_5(%arg0: i32) -> (i32, i32) {
    %c0_i32 = arith.constant 0 : i32
    %c0_i32_0 = arith.constant 0 : i32
    %c0_i32_1 = arith.constant 0 : i32
    return %c0_i32, %c0_i32_0 : i32, i32
  }
  func.func @transform_6(%arg0: i32) -> (i32, i32) {
    %c0_i32 = arith.constant 0 : i32
    %c0_i32_0 = arith.constant 0 : i32
    %c0_i32_1 = arith.constant 0 : i32
    return %c0_i32, %c0_i32_0 : i32, i32
  }
  func.func @transform_7(%arg0: i32) -> (i32, i32) {
    %c0_i32 = arith.constant 0 : i32
    %c0_i32_0 = arith.constant 0 : i32
    %c0_i32_1 = arith.constant 0 : i32
    return %c0_i32, %c0_i32_0 : i32, i32
  }
  func.func @transform_8(%arg0: i32) -> (i32, i32) {
    %c0_i32 = arith.constant 0 : i32
    %c0_i32_0 = arith.constant 0 : i32
    %c0_i32_1 = arith.constant 0 : i32
    return %c0_i32, %c0_i32_0 : i32, i32
  }
  func.func @transform_9(%arg0: i32) -> (i32, i32) {
    %c0_i32 = arith.constant 0 : i32
    %c0_i32_0 = arith.constant 0 : i32
    %c0_i32_1 = arith.constant 0 : i32
    return %c0_i32, %c0_i32_0 : i32, i32
  }
  func.func @transform_10(%arg0: i32) -> (i32, i32) {
    %c0_i32 = arith.constant 0 : i32
    %c0_i32_0 = arith.constant 0 : i32
    return %arg0, %c0_i32 : i32, i32
  }
  func.func @transform_11(%arg0: i32) -> (i32, i32) {
    %c0_i32 = arith.constant 0 : i32
    %c0_i32_0 = arith.constant 0 : i32
    return %arg0, %c0_i32 : i32, i32
  }
}

module attributes {stable_mosaic.version = 11 : i64} {
  func.func @_vae_kernel(%arg0: i32, %arg1: memref<16x16xf32, #tpu.memory_space<vmem>>, %arg2: memref<16x16xf32, #tpu.memory_space<vmem>>, %arg3: memref<16x32xbf16, #tpu.memory_space<vmem>>, %arg4: memref<1x32xf32, #tpu.memory_space<vmem>>, %arg5: memref<32x16xf32, #tpu.memory_space<vmem>>, %arg6: memref<1x16xf32, #tpu.memory_space<vmem>>, %arg7: memref<8x32xbf16, #tpu.memory_space<vmem>>, %arg8: memref<1x32xf32, #tpu.memory_space<vmem>>, %arg9: memref<32x16xbf16, #tpu.memory_space<vmem>>, %arg10: memref<1x16xf32, #tpu.memory_space<vmem>>, %arg11: memref<16x8xf32, #tpu.memory_space<vmem>>, %arg12: memref<16x128xf32, #tpu.memory_space<vmem>>) attributes {dimension_semantics = [#tpu.dimension_semantics<parallel>], iteration_bounds = array<i64: 2>, scalar_prefetch = 0 : i64, scratch_operands = 0 : i64, tpu.core_type = #tpu.core_type<tc>, window_params = [{transform_indices = @transform_0, window_bounds = array<i64: 16, 16>}, {pipeline_mode = #tpu.pipeline_mode<synchronous>, transform_indices = @transform_1, window_bounds = array<i64: 16, 16>}, {pipeline_mode = #tpu.pipeline_mode<synchronous>, transform_indices = @transform_2, window_bounds = array<i64: 16, 32>}, {pipeline_mode = #tpu.pipeline_mode<synchronous>, transform_indices = @transform_3, window_bounds = array<i64: 1, 32>}, {pipeline_mode = #tpu.pipeline_mode<synchronous>, transform_indices = @transform_4, window_bounds = array<i64: 32, 16>}, {pipeline_mode = #tpu.pipeline_mode<synchronous>, transform_indices = @transform_5, window_bounds = array<i64: 1, 16>}, {pipeline_mode = #tpu.pipeline_mode<synchronous>, transform_indices = @transform_6, window_bounds = array<i64: 8, 32>}, {pipeline_mode = #tpu.pipeline_mode<synchronous>, transform_indices = @transform_7, window_bounds = array<i64: 1, 32>}, {pipeline_mode = #tpu.pipeline_mode<synchronous>, transform_indices = @transform_8, window_bounds = array<i64: 32, 16>}, {pipeline_mode = #tpu.pipeline_mode<synchronous>, transform_indices = @transform_9, window_bounds = array<i64: 1, 16>}, {transform_indices = @transform_10, window_bounds = array<i64: 16, 8>}, {transform_indices = @transform_11, window_bounds = array<i64: 16, 128>}]} {
    %c0 = arith.constant 0 : index
    %c0_0 = arith.constant 0 : index
    %0 = vector.load %arg1[%c0, %c0_0] : memref<16x16xf32, #tpu.memory_space<vmem>>, vector<16x16xf32>
    %c0_1 = arith.constant 0 : index
    %c0_2 = arith.constant 0 : index
    %1 = vector.load %arg2[%c0_1, %c0_2] : memref<16x16xf32, #tpu.memory_space<vmem>>, vector<16x16xf32>
    %2 = arith.mulf %0, %1 : vector<16x16xf32>
    %3 = arith.truncf %2 : vector<16x16xf32> to vector<16x16xbf16>
    %c0_3 = arith.constant 0 : index
    %c0_4 = arith.constant 0 : index
    %4 = vector.load %arg3[%c0_3, %c0_4] : memref<16x32xbf16, #tpu.memory_space<vmem>>, vector<16x32xbf16>
    %cst = arith.constant dense<0.000000e+00> : vector<16x32xf32>
    %5 = tpu.matmul %3, %4, %cst {dimension_numbers = #tpu.dot_dimension_numbers<[1], [0], [0], [1], [0, 0, 1, 1], [], []>} : vector<16x16xbf16>, vector<16x32xbf16>, vector<16x32xf32> -> vector<16x32xf32>
    %c0_5 = arith.constant 0 : index
    %c0_6 = arith.constant 0 : index
    %6 = vector.load %arg4[%c0_5, %c0_6] : memref<1x32xf32, #tpu.memory_space<vmem>>, vector<1x32xf32>
    %7 = vector.broadcast %6 : vector<1x32xf32> to vector<16x32xf32>
    %8 = arith.addf %5, %7 : vector<16x32xf32>
    %cst_7 = arith.constant 0.000000e+00 : f32
    %9 = vector.broadcast %cst_7 : f32 to vector<16x32xf32>
    %10 = arith.maximumf %8, %9 : vector<16x32xf32>
    %c0_8 = arith.constant 0 : index
    %c0_9 = arith.constant 0 : index
    %11 = vector.load %arg5[%c0_8, %c0_9] : memref<32x16xf32, #tpu.memory_space<vmem>>, vector<32x16xf32>
    %cst_10 = arith.constant dense<0.000000e+00> : vector<16x16xf32>
    %12 = tpu.matmul %10, %11, %cst_10 {dimension_numbers = #tpu.dot_dimension_numbers<[1], [0], [0], [1], [0, 0, 1, 1], [], []>} : vector<16x32xf32>, vector<32x16xf32>, vector<16x16xf32> -> vector<16x16xf32>
    %c0_11 = arith.constant 0 : index
    %c0_12 = arith.constant 0 : index
    %13 = vector.load %arg6[%c0_11, %c0_12] : memref<1x16xf32, #tpu.memory_space<vmem>>, vector<1x16xf32>
    %14 = vector.broadcast %13 : vector<1x16xf32> to vector<16x16xf32>
    %15 = arith.addf %12, %14 : vector<16x16xf32>
    %16 = vector.extract_strided_slice %15 {offsets = [0, 0], sizes = [16, 8], strides = [1, 1]} : vector<16x16xf32> to vector<16x8xf32>
    %17 = vector.extract_strided_slice %15 {offsets = [0, 8], sizes = [16, 8], strides = [1, 1]} : vector<16x16xf32> to vector<16x8xf32>
    %cst_13 = arith.constant 5.000000e-01 : f32
    %18 = vector.broadcast %cst_13 : f32 to vector<16x8xf32>
    %19 = arith.mulf %18, %17 : vector<16x8xf32>
    %20 = math.exp %19 : vector<16x8xf32>
    %c0_14 = arith.constant 0 : index
    %c0_15 = arith.constant 0 : index
    %21 = vector.load %arg11[%c0_14, %c0_15] : memref<16x8xf32, #tpu.memory_space<vmem>>, vector<16x8xf32>
    %22 = arith.mulf %21, %20 : vector<16x8xf32>
    %23 = arith.addf %16, %22 : vector<16x8xf32>
    %24 = arith.truncf %23 : vector<16x8xf32> to vector<16x8xbf16>
    %c0_16 = arith.constant 0 : index
    %c0_17 = arith.constant 0 : index
    %25 = vector.load %arg7[%c0_16, %c0_17] : memref<8x32xbf16, #tpu.memory_space<vmem>>, vector<8x32xbf16>
    %cst_18 = arith.constant dense<0.000000e+00> : vector<16x32xf32>
    %26 = tpu.matmul %24, %25, %cst_18 {dimension_numbers = #tpu.dot_dimension_numbers<[1], [0], [0], [1], [0, 0, 1, 1], [], []>} : vector<16x8xbf16>, vector<8x32xbf16>, vector<16x32xf32> -> vector<16x32xf32>
    %c0_19 = arith.constant 0 : index
    %c0_20 = arith.constant 0 : index
    %27 = vector.load %arg8[%c0_19, %c0_20] : memref<1x32xf32, #tpu.memory_space<vmem>>, vector<1x32xf32>
    %28 = vector.broadcast %27 : vector<1x32xf32> to vector<16x32xf32>
    %29 = arith.addf %26, %28 : vector<16x32xf32>
    %cst_21 = arith.constant 0.000000e+00 : f32
    %30 = vector.broadcast %cst_21 : f32 to vector<16x32xf32>
    %31 = arith.maximumf %29, %30 : vector<16x32xf32>
    %32 = arith.truncf %31 : vector<16x32xf32> to vector<16x32xbf16>
    %c0_22 = arith.constant 0 : index
    %c0_23 = arith.constant 0 : index
    %33 = vector.load %arg9[%c0_22, %c0_23] : memref<32x16xbf16, #tpu.memory_space<vmem>>, vector<32x16xbf16>
    %cst_24 = arith.constant dense<0.000000e+00> : vector<16x16xf32>
    %34 = tpu.matmul %32, %33, %cst_24 {dimension_numbers = #tpu.dot_dimension_numbers<[1], [0], [0], [1], [0, 0, 1, 1], [], []>} : vector<16x32xbf16>, vector<32x16xbf16>, vector<16x16xf32> -> vector<16x16xf32>
    %c0_25 = arith.constant 0 : index
    %c0_26 = arith.constant 0 : index
    %35 = vector.load %arg10[%c0_25, %c0_26] : memref<1x16xf32, #tpu.memory_space<vmem>>, vector<1x16xf32>
    %36 = vector.broadcast %35 : vector<1x16xf32> to vector<16x16xf32>
    %37 = arith.addf %34, %36 : vector<16x16xf32>
    %38 = arith.negf %37 : vector<16x16xf32>
    %39 = math.exp %38 : vector<16x16xf32>
    %cst_27 = arith.constant 1.000000e+00 : f32
    %40 = vector.broadcast %cst_27 : f32 to vector<16x16xf32>
    %41 = arith.addf %40, %39 : vector<16x16xf32>
    %42 = arith.divf %40, %41 : vector<16x16xf32>
    %c0_28 = arith.constant 0 : index
    %c0_29 = arith.constant 0 : index
    %43 = vector.load %arg12[%c0_28, %c0_29] : memref<16x128xf32, #tpu.memory_space<vmem>>, vector<16x16xf32>
    tpu.vector_store %arg12[%c0_28, %c0_29], %42 {strides = array<i32>} : memref<16x128xf32, #tpu.memory_space<vmem>>, vector<16x16xf32>,
    %c0_30 = arith.constant 0 : index
    %c16 = arith.constant 16 : index
    %44 = vector.load %arg12[%c0_30, %c16] : memref<16x128xf32, #tpu.memory_space<vmem>>, vector<16x16xf32>
    tpu.vector_store %arg12[%c0_30, %c16], %2 {strides = array<i32>} : memref<16x128xf32, #tpu.memory_space<vmem>>, vector<16x16xf32>,
    %c0_31 = arith.constant 0 : index
    %c32 = arith.constant 32 : index
    %45 = vector.load %arg12[%c0_31, %c32] : memref<16x128xf32, #tpu.memory_space<vmem>>, vector<16x16xf32>
    tpu.vector_store %arg12[%c0_31, %c32], %15 {strides = array<i32>} : memref<16x128xf32, #tpu.memory_space<vmem>>, vector<16x16xf32>,
    %cst_32 = arith.constant 0.000000e+00 : f32
    %46 = vector.broadcast %cst_32 : f32 to vector<16x80xf32>
    %c0_33 = arith.constant 0 : index
    %c48 = arith.constant 48 : index
    %47 = vector.load %arg12[%c0_33, %c48] : memref<16x128xf32, #tpu.memory_space<vmem>>, vector<16x80xf32>
    tpu.vector_store %arg12[%c0_33, %c48], %46 {strides = array<i32>} : memref<16x128xf32, #tpu.memory_space<vmem>>, vector<16x80xf32>,
    return
  }
  func.func @transform_0(%arg0: i32) -> (i32, i32) {
    %c0_i32 = arith.constant 0 : i32
    %c0_i32_0 = arith.constant 0 : i32
    return %arg0, %c0_i32 : i32, i32
  }
  func.func @transform_1(%arg0: i32) -> (i32, i32) {
    %c0_i32 = arith.constant 0 : i32
    %c0_i32_0 = arith.constant 0 : i32
    %c0_i32_1 = arith.constant 0 : i32
    return %c0_i32, %c0_i32_0 : i32, i32
  }
  func.func @transform_2(%arg0: i32) -> (i32, i32) {
    %c0_i32 = arith.constant 0 : i32
    %c0_i32_0 = arith.constant 0 : i32
    %c0_i32_1 = arith.constant 0 : i32
    return %c0_i32, %c0_i32_0 : i32, i32
  }
  func.func @transform_3(%arg0: i32) -> (i32, i32) {
    %c0_i32 = arith.constant 0 : i32
    %c0_i32_0 = arith.constant 0 : i32
    %c0_i32_1 = arith.constant 0 : i32
    return %c0_i32, %c0_i32_0 : i32, i32
  }
  func.func @transform_4(%arg0: i32) -> (i32, i32) {
    %c0_i32 = arith.constant 0 : i32
    %c0_i32_0 = arith.constant 0 : i32
    %c0_i32_1 = arith.constant 0 : i32
    return %c0_i32, %c0_i32_0 : i32, i32
  }
  func.func @transform_5(%arg0: i32) -> (i32, i32) {
    %c0_i32 = arith.constant 0 : i32
    %c0_i32_0 = arith.constant 0 : i32
    %c0_i32_1 = arith.constant 0 : i32
    return %c0_i32, %c0_i32_0 : i32, i32
  }
  func.func @transform_6(%arg0: i32) -> (i32, i32) {
    %c0_i32 = arith.constant 0 : i32
    %c0_i32_0 = arith.constant 0 : i32
    %c0_i32_1 = arith.constant 0 : i32
    return %c0_i32, %c0_i32_0 : i32, i32
  }
  func.func @transform_7(%arg0: i32) -> (i32, i32) {
    %c0_i32 = arith.constant 0 : i32
    %c0_i32_0 = arith.constant 0 : i32
    %c0_i32_1 = arith.constant 0 : i32
    return %c0_i32, %c0_i32_0 : i32, i32
  }
  func.func @transform_8(%arg0: i32) -> (i32, i32) {
    %c0_i32 = arith.constant 0 : i32
    %c0_i32_0 = arith.constant 0 : i32
    %c0_i32_1 = arith.constant 0 : i32
    return %c0_i32, %c0_i32_0 : i32, i32
  }
  func.func @transform_9(%arg0: i32) -> (i32, i32) {
    %c0_i32 = arith.constant 0 : i32
    %c0_i32_0 = arith.constant 0 : i32
    %c0_i32_1 = arith.constant 0 : i32
    return %c0_i32, %c0_i32_0 : i32, i32
  }
  func.func @transform_10(%arg0: i32) -> (i32, i32) {
    %c0_i32 = arith.constant 0 : i32
    %c0_i32_0 = arith.constant 0 : i32
    return %arg0, %c0_i32 : i32, i32
  }
  func.func @transform_11(%arg0: i32) -> (i32, i32) {
    %c0_i32 = arith.constant 0 : i32
    %c0_i32_0 = arith.constant 0 : i32
    return %arg0, %c0_i32 : i32, i32
  }
}

</mosaic_0001>

<bundles_post_ra>
// kernel: tpu_custom_call.1
= control target key start
LH: loop header
LB: loop body
LE: loop exit
PB: predicated region body
PF: predicated region fallthrough
CT: control target
= control target key end

     0   :  { %16 = vsyncpa [#allocation3], 0  ;;  %s1298_s0 = inlined_call_operand.vmem [shape: f32[32,16], index: 0, kind: input, shape index: {}]   ;;  %s1299_s1 = inlined_call_operand.vmem [shape: f32[16,16], index: 1, kind: input, shape index: {}]   ;;  %s1300_s2 = inlined_call_operand.vmem [shape: bf16[16,32], index: 2, kind: input, shape index: {}]   ;;  %s1301_s3 = inlined_call_operand.vmem [shape: f32[1,32], index: 3, kind: input, shape index: {}]   ;;  %s1302_s4 = inlined_call_operand.vmem [shape: f32[32,16], index: 4, kind: input, shape index: {}]   ;;  %s1303_s5 = inlined_call_operand.vmem [shape: f32[1,16], index: 5, kind: input, shape index: {}]   ;;  %s1304_s6 = inlined_call_operand.vmem [shape: bf16[8,32], index: 6, kind: input, shape index: {}]   ;;  %s1305_s7 = inlined_call_operand.vmem [shape: f32[1,32], index: 7, kind: input, shape index: {}]   ;;  %s1306_s8 = inlined_call_operand.vmem [shape: bf16[32,16], index: 8, kind: input, shape index: {}]   ;;  %s1307_s9 = inlined_call_operand.vmem [shape: f32[1,16], index: 9, kind: input, shape index: {}]   ;;  %s1308_s10 = inlined_call_operand.vmem [shape: f32[32,8], index: 10, kind: input, shape index: {}]   ;;  %s1309_s11 = inlined_call_operand.hbm [shape: f32[32,128], index: 11, kind: output, shape index: {}]  }
   0x1   :  { %18 = vsyncpa [#allocation3 + $0x1], 0  ;;  %s1122_s17 = smov 0   ;;  %s1124_s18 = smov 0  }
   0x2   :  { %s1126_s19 = smov 0   ;;  %s1128_s20 = smov 0  }
   0x3 LB: > { %s1143_s21 = sadd.s32 4294967295, %s1052_s20   ;;  %s848_s22 = sadd.s32 4294967294, %s1052_s20   ;;  %s1052_s20 = sphi %s1128_s20, %s1315_s20   ;;  %s1048_s19 = sphi %s1126_s19, %s1314_s19   ;;  %s1044_s18 = sphi %s1124_s18, %s1313_s18   ;;  %s1040_s17 = sphi %s1122_s17, %s1312_s17  }
   0x4   : > { %s1147_s23 = sadd.s32 1, %s1052_s20   ;;  %s272_s24 = sadd.s32 1, %s1048_s19 }
   0x5   : > { %s269_s25 = ssub.s32 %s1052_s20, %s1147_s23  ;;  %p282_p0 = scmp.ne.s32.totalorder %s1048_s19, %s1044_s18 }
   0x6   : > { %p270_p1 = scmp.eq.s32.totalorder %s269_s25, 0  ;;  %p283_p2 = scmp.eq.s32.totalorder %s1143_s21, 1 }
   0x7   : > { %p288_p3 = scmp.ne.s32.totalorder %s1044_s18, %s1040_s17  ;;  %p289_p4 = scmp.eq.s32.totalorder %s848_s22, 1 }
   0x8   : > { %s1158_s26 = scalar_select %p270_p1, %s1048_s19, %s272_s24  }
   0x9   : > { %p1160_p5 = por %p283_p2, %p282_p0  ;;  %p1164_p6 = por %p289_p4, %p288_p3 }
   0xa   : > { %p851_p7 = scmp.ge.s32.totalorder %s1052_s20, 1  ;;  %p352_p8 = scmp.lt.s32.totalorder %s1052_s20, 3 }
   0xc   : > { %p353_p9 = pnand %p851_p7, %p352_p8 }
   0xd   : > { %v975_v0 = vld [vmem:[%s1300_s2] sm:$0xff] (!%p353_p9)   ;;  %v1054_v1 = vmov (!%p353_p9), 0.0   ;;  %s853_s12 = sshll.u32 (!%p353_p9), %s1143_s21, 1  ;;  %vm1055_vm0 = vmmov (!%p353_p9), 0   ;;  %v481_v3 = vld [vmem:[%s1302_s4 + $0x8] sm:$0xff] (!%p353_p9)  ;;  %vm433_vm1 = vcmask (!%p353_p9), 130048  }
   0xe   : > { %356 = sbr.rel (%p353_p9) target bundleno = 1084 (0x43c), region = 64  ;;  %890 = vmatprep.subr.bf16.mxu0 (!%p353_p9), %v1054_v1  ;;  %v480_v2 = vld [vmem:[%s1302_s4] sm:$0xff] (!%p353_p9)  ;;  %892 = vmatprep.mubr.msk.bf16.mxu0 (!%p353_p9), %vm1055_vm0, %v1054_v1  ;;  %p398_p10 = scmp.lt.s32.totalorder (!%p353_p9), %s853_s12, 3  ;;  %v414_v6 = vld [vmem:[%s1299_s1 + $0x8] sm:$0xff] (!%p353_p9)  ;;  %v482_v12 = vld [vmem:[%s1302_s4 + $0x10] sm:$0xff] (!%p353_p9)  ;;  %vm491_vm2 = vcmask (!%p353_p9), 261120  }
   0xf   : > { %891 = vmatpush3.bf16.msra.mxu0 (!%p353_p9), %v975_v0  ;;  %v921_v4 = vpack.c.bf16 (!%p353_p9), %v481_v3, %v480_v2  ;;  %v413_v5 = vld [vmem:[%s1299_s1] sm:$0xff] (!%p353_p9)  ;;  %v483_v13 = vld [vmem:[%s1302_s4 + $0x18] sm:$0xff] (!%p353_p9)  ;;  %s1056_s30 = smov (!%p353_p9), 16   ;;  %s1057_s24 = smov (!%p353_p9), 32   ;;  %vm606_vm3 = vcmask (!%p353_p9), 1043456   ;;  %vm602_vm4 = vcmask (!%p353_p9), 64512  }
  0x10   : > { %907 = vmatprep.subr.bf16.mxu0 (!%p353_p9), %v1054_v1  ;;  %v925_v14 = vpack.c.bf16 (!%p353_p9), %v483_v13, %v482_v12  ;;  %v857_v15 = vld [vmem:[%s1301_s3] ss:$0 sm:$0xff] (!%p353_p9)  ;;  %v977_v47 = vld [vmem:[%s1306_s8 + $0x8] sm:$0xff] (!%p353_p9)   ;;  %s394_s14 = sand.u32 (!%p353_p9), 1, %s1044_s18   ;;  %vm743_vm5 = vcmask (!%p353_p9), 261248   ;;  %vm754_vm6 = vcmask (!%p353_p9), 392448  }
  0x11   : > { %922 = vmatprep.subr.bf16.mxu1 (!%p353_p9), %v921_v4  ;;  %v860_v24 = vld [vmem:[%s1303_s5] ss:$0 sm:$0xff] (!%p353_p9)  ;;  %s876_s16 = sshll.u32 (!%p353_p9), %s1143_s21, 8  ;;  %vm757_vm7 = vcmask (!%p353_p9), 1047936   ;;  %s1257_s21 = scalar_lea.sflag (!%p353_p9), [#allocation3], %s394_s14 }
  0x12   : > { %924 = vmatpush3.bf16.msra.mxu1 (!%p353_p9), %v921_v4  ;;  %v594_v33 = vld [vmem:[%s1304_s6] sm:$0xf] (!%p353_p9)  ;;  %s1249_s29 = scalar_lea.hbm (!%p353_p9), %s1309_s11, %s876_s16  ;;  %s1059_s13 = smov (!%p353_p9), [#allocation2]  }
  0x13   : > { %926 = vmatprep.subr.bf16.mxu1 (!%p353_p9), %v925_v14  ;;  %v608_v34 = vsel (!%p353_p9), %vm606_vm3, %v594_v33, 0  ;;  %v976_v46 = vld [vmem:[%s1306_s8] sm:$0xff] (!%p353_p9)  }
  0x14   : > { %v863_v48 = vld [vmem:[%s1305_s7] ss:$0 sm:$0xff] (!%p353_p9) }
  0x15   : > { %s1317_s12 = smov (!%p398_p10, %s853_s12), 3  ;;  %v865_v58 = vld [vmem:[%s1307_s9] ss:$0 sm:$0xff] }
  0x16   : > { %s854_s22 = sshll.u32 %s1317_s12, 3  ;;  %928 = vmatpush3.bf16.msra.mxu1 %v925_v14 }
  0x17   : > { %s401_s15 = scalar_lea.vmem %s1298_s0, %s854_s22  ;;  %913 = vmatprep.subr.bf16.mxu1 %v1054_v1 }
  0x18   : > { %v411_v7 = vld [vmem:[%s401_s15] sm:$0xff]  ;;  %v412_v8 = vld [vmem:[%s401_s15 + $0x8] sm:$0xff]  ;;  %s407_s15 = scalar_lea.vmem %s1308_s10, %s854_s22 }
  0x19   : > { %v415_v9 = vmul.f32 %v413_v5, %v411_v7  ;;  %v416_v10 = vmul.f32 %v414_v6, %v412_v8  ;;  %v579_v37 = vld [vmem:[%s407_s15] sm:$0xff]  ;;  %v580_v39 = vld [vmem:[%s407_s15 + $0x8] sm:$0xff]  ;;  %s852_s15 = sshll.u32 %s394_s14, 4 }
  0x1a   : > { %s396_s25 = scalar_lea.vmem [#allocation2], %s852_s15  ;;  %s994_s15 = sshll.u32 %s1059_s13, 4  ;;  %s995_s15 = int_to_ptr.vmem [resolvable:$false] %s994_s15 }
  0x1b   : > { %v417_v11 = vpack.c.bf16 %v416_v10, %v415_v9  ;;  %737 = vrot.lane.b32.xlu1 %v415_v9, %s1056_s30  ;;  %s774_s12 = sshll.u32 %s396_s25, 4  ;;  %s996_s16 = scalar_lea.vmem %s995_s15, 512  ;;  %s1251_s12 = int_to_ptr.vmem [resolvable:$true] %s774_s12 }
  0x1c   : > { %p997_p0 = scmp.lt.s32.totalorder %s1251_s12, %s995_s15 }
  0x1d   : > { %893 = vmatmul.mubr.msk.bf16.vlgmr.msra.gmra.mrb[0].mxu0 %vm433_vm1, %v417_v11 }
  0x1e   : > { %909 = vmatprep.mubr.msk.bf16.mxu0 %vm1055_vm0, %v1054_v1  ;;  %908 = vmatpush3.bf16.msra.mxu0 %v608_v34 }
  0x1f   : > { %739 = vrot.lane.b32.xlu1 %v416_v10, %s1056_s30  ;;  %s1058_s30 = smov 120  }
  0x8d   : > { %v738_v8 = vpop.permute.xlu1 %737 }
  0x91   : > { %v740_v9 = vpop.permute.xlu1 %739 }
  0xf0   : > { %v471_v16 = vpop.f32.mrb[0].mxu0 }
  0xf1   : > { %v472_v17 = vadd.f32 %v857_v15, %v471_v16  ;;  %v894_v18 = vpop.f32.mrb[1].mxu0 }
  0xf2   : > { %v474_v19 = vpop.f32.mrb[2].mxu0 }
  0xf3   : > { %v478_v20 = vmax.f32 %v472_v17, 0.0  ;;  %v475_v21 = vadd.f32 %v857_v15, %v474_v19  ;;  %v895_v22 = vpop.f32.mrb[3].mxu0 }
  0xf5   : > { %v479_v23 = vmax.f32 %v475_v21, 0.0  ;;  %904 = vmatprep.mubr.msk.f32.mxu1 %vm491_vm2, %v478_v20 }
  0xf7   : > { %905 = vmatmul.mubr.msk.f32.vlgmr.msra.gmra.mrb[0].mxu1 %vm491_vm2, %v479_v23 }
  0xf8   : > { %917 = vmatprep.mubr.msk.bf16.mxu1 %vm1055_vm0, %v1054_v1  ;;  %914 = vmatpush3.bf16.msra.mxu1 %v976_v46 }
  0xf9   : > { %915 = vmatprep.subr.bf16.mxu1 %v1054_v1 }
  0xfc   : > { %916 = vmatpush3.bf16.msra.mxu1 %v977_v47 }
 0x1ca   : > { %v906_v25 = vpop.f32.mrb[0].mxu1 }
 0x1cb   : > { %v570_v26 = vadd.f32 %v906_v25, %v860_v24  ;;  %v564_v27 = vpop.f32.mrb[1].mxu1 }
 0x1cc   : > { %v565_v28 = vadd.f32 %v860_v24, %v564_v27 }
 0x1cd   : > { %750 = vrot.lane.b32.xlu1 %v570_v26, %s1057_s24  ;;  %v574_v29 = vmul.f32 0.5, %v570_v26 }
 0x1ce   : > { %v573_v30 = vmul.f32 0.5, %v565_v28 }
 0x1cf   : > { %v577_v32 = vmul.f32 1.442695, %v574_v29 }
 0x1d0   : > { %v575_v31 = vmul.f32 1.442695, %v573_v30 }
 0x1d2   : > { %978 = vpow2.f32 %v575_v31 }
 0x1d3   : > { %980 = vpow2.f32 %v577_v32 }
 0x1dc   : > { %v979_v35 = vpop.eup %978 }
 0x1dd   : > { %583 = vrot.lane.b32.xlu0 %v979_v35, %s1058_s30  ;;  %v981_v36 = vpop.eup %980 }
 0x1e1   : > { %585 = vrot.lane.b32.xlu0 %v981_v36, %s1058_s30  ;;  %s990_s30 = scalar_lea.vmem %s1251_s12, 256 }
 0x1e2   : > { %p991_p11 = scmp.ne.s32.totalorder %s1251_s12, %s990_s30  ;;  %p998_p1 = scmp.lt.s32.totalorder %s996_s16, %s990_s30 }
 0x1e4   : > { %p992_p12 = pnand %p991_p11, %p1160_p5  ;;  %p999_p2 = por %p998_p1, %p997_p0 }
 0x1e5   : > { %748 = vrot.lane.b32.xlu0 %v565_v28, %s1057_s24 }
 0x1e6   : > { %p993_p13 = pneg %p992_p12 }
 0x1e8   : > { %p1000_p3 = pnand %p999_p2, %p993_p13 }
 0x23f   : > { %v751_v13 = vpop.permute.xlu1 %750 }
 0x24f   : > { %v584_v38 = vpop.permute.xlu0 %583 }
 0x250   : > { %v589_v40 = vmul.f32 %v584_v38, %v579_v37 }
 0x252   : > { %v591_v43 = vadd.f32 %v589_v40, %v565_v28 }
 0x253   : > { %v586_v41 = vpop.permute.xlu0 %585 }
 0x254   : > { %v590_v42 = vmul.f32 %v586_v41, %v580_v39 }
 0x256   : > { %v592_v44 = vadd.f32 %v590_v42, %v570_v26 }
 0x257   : > { %v749_v12 = vpop.permute.xlu0 %748 }
 0x258   : > { %v593_v45 = vpack.c.bf16 %v592_v44, %v591_v43 }
 0x25a   : > { %910 = vmatmul.mubr.msk.bf16.vlgmr.msra.gmra.mrb[4].mxu0 %vm602_vm4, %v593_v45 }
 0x32d   : > { %v644_v49 = vpop.f32.mrb[4].mxu0 }
 0x32e   : > { %v645_v50 = vadd.f32 %v863_v48, %v644_v49  ;;  %v911_v51 = vpop.f32.mrb[5].mxu0 }
 0x32f   : > { %v647_v52 = vpop.f32.mrb[6].mxu0 }
 0x330   : > { %v648_v53 = vadd.f32 %v863_v48, %v647_v52  ;;  %v912_v54 = vpop.f32.mrb[7].mxu0  ;;  %v651_v55 = vmax.f32 %v645_v50, 0.0 }
 0x332   : > { %v652_v56 = vmax.f32 %v648_v53, 0.0 }
 0x334   : > { %v653_v57 = vpack.c.bf16 %v652_v56, %v651_v55 }
 0x336   : > { %918 = vmatmul.mubr.msk.bf16.vlgmr.msra.gmra.mrb[4].mxu1 %vm491_vm2, %v653_v57 }
 0x409   : > { %v714_v59 = vpop.f32.mrb[4].mxu1 }
 0x40a   : > { %v715_v60 = vadd.f32 %v865_v58, %v714_v59  ;;  %v919_v61 = vpop.f32.mrb[5].mxu1 }
 0x40b   : > { %v717_v62 = vpop.f32.mrb[6].mxu1 }
 0x40c   : > { %v869_v63 = vmul.f32 -1.442695, %v715_v60  ;;  %v718_v0 = vadd.f32 %v865_v58, %v717_v62  ;;  %v920_v2 = vpop.f32.mrb[7].mxu1 }
 0x40e   : > { %982 = vpow2.f32 %v869_v63  ;;  %v870_v3 = vmul.f32 -1.442695, %v718_v0 }
 0x410   : > { %984 = vpow2.f32 %v870_v3 }
 0x418   : > { %v983_v4 = vpop.eup %982 }
 0x419   : > { %v727_v5 = vadd.f32 1.0, %v983_v4 }
 0x41a   : > { %v985_v6 = vpop.eup %984 }
 0x41b   : > { %986 = vrcp.f32 %v727_v5  ;;  %v728_v7 = vadd.f32 1.0, %v985_v6 }
 0x41d   : > { %988 = vrcp.f32 %v728_v7 }
 0x425   : > { %v987_v10 = vpop.eup %986 }
 0x426   : > { %733 = vst.msk [vmem:[%s396_s25] sm:$0xff] %vm433_vm1, %v987_v10 }
 0x427   : > { %v989_v11 = vpop.eup %988  ;;  %744 = vst.msk [vmem:[%s396_s25] sm:$0xff] %vm743_vm5, %v738_v8 }
 0x428   : > { %734 = vst.msk [vmem:[%s396_s25 + $0x8] sm:$0xff] %vm433_vm1, %v989_v11 }
 0x429   : > { %755 = vst.msk [vmem:[%s396_s25] sm:$0xff] %vm754_vm6, %v749_v12 }
 0x42a   : > { %745 = vst.msk [vmem:[%s396_s25 + $0x8] sm:$0xff] %vm743_vm5, %v740_v9 }
 0x42b   : > { %758 = vst.msk [vmem:[%s396_s25] sm:$0xff] %vm757_vm7, %v1054_v1 }
 0x42c   : > { %756 = vst.msk [vmem:[%s396_s25 + $0x8] sm:$0xff] %vm754_vm6, %v751_v13 }
 0x42d   : > { %759 = vst.msk [vmem:[%s396_s25 + $0x8] sm:$0xff] %vm757_vm7, %v1054_v1 }
 0x42e   : > { %1003 = shalt.err (!%p1000_p3)
}
 0x42f   : > { %s1004_s14 = scalar_lea.hbm %s1249_s29, 256  ;;  %s1008_s24 = scalar_lea.hbm %s1309_s11, 512 }
 0x430   : > { %p1005_p4 = scmp.ne.s32.totalorder %s1249_s29, %s1004_s14  ;;  %p1009_p9 = scmp.lt.u32.totalorder %s1249_s29, %s1309_s11 }
 0x431   : > { %p1010_p10 = scmp.lt.u32.totalorder %s1008_s24, %s1004_s14  ;;  %p1012_p12 = scmp.lt.u32.totalorder %s1004_s14, %s1249_s29 }
 0x432   : > { %p1006_p7 = pnand %p1005_p4, %p1160_p5 }
 0x433   : > { %p1011_p11 = por %p1010_p10, %p1009_p9 }
 0x434   : > { %p1007_p8 = pneg %p1006_p7 }
 0x435   : > { %p1013_p13 = por %p1012_p12, %p1011_p11 }
 0x437   : > { %p1014_p0 = pnand %p1013_p13, %p1007_p8 }
 0x439   : > { %1017 = shalt.err (!%p1014_p0)
}
 0x43a   : > { %s1060_s30 = smov 128   ;;  %s1061_s16 = smov 8  }
 0x43b   : > { %929 = dma.vmem_to_hbm [thread:$0]  (%p1160_p5), %s1251_s12, 256, %s1249_s29, %s1257_s21, %s1060_s30, %s1060_s30, %s1061_s16  }
 0x43c PF: > { %p935_p1 = scmp.ge.s32.totalorder %s1052_s20, 2  ;;  %s789_s25 = sand.u32 1, %s1040_s17  }
 0x43d   : > { %s790_s14 = scalar_lea.sflag [#allocation3], %s789_s25 }
 0x43e   : > { %p932_p2 = pnand %p935_p1, %p1164_p6 }
 0x440   : > { %1035 = dma.done.wait (!%p932_p2), %s790_s14, 256  }
 0x441   : > { %1037 = vsyncadd (!%p932_p2), %s790_s14, 4294967040  ;;  %p21_p3 = scmp.ge.s32.totalorder %s1147_s23, 4   ;;  %s1312_s17 = smov %s1044_s18 }
 0x442   : > { %s1313_s18 = smov %s1048_s19  ;;  %s1314_s19 = smov %s1158_s26 }
 0x443   : > { %s1315_s20 = smov %s1147_s23  ;;  %23 = sbr.rel (!%p21_p3) target bundleno = 3 (0x3), region = 102 }
 0x44a   :  { %795 = vsyncpa [#allocation3], 1 }
 0x44b   :  { %797 = vsyncpa [#allocation3 + $0x1], 1 }

// kernel: tpu_custom_call.1
= control target key start
LH: loop header
LB: loop body
LE: loop exit
PB: predicated region body
PF: predicated region fallthrough
CT: control target
= control target key end

     0   :  { %16 = vsyncpa [#allocation3], 0  ;;  %s1298_s0 = inlined_call_operand.vmem [shape: f32[32,16], index: 0, kind: input, shape index: {}]   ;;  %s1299_s1 = inlined_call_operand.vmem [shape: f32[16,16], index: 1, kind: input, shape index: {}]   ;;  %s1300_s2 = inlined_call_operand.vmem [shape: bf16[16,32], index: 2, kind: input, shape index: {}]   ;;  %s1301_s3 = inlined_call_operand.vmem [shape: f32[1,32], index: 3, kind: input, shape index: {}]   ;;  %s1302_s4 = inlined_call_operand.vmem [shape: f32[32,16], index: 4, kind: input, shape index: {}]   ;;  %s1303_s5 = inlined_call_operand.vmem [shape: f32[1,16], index: 5, kind: input, shape index: {}]   ;;  %s1304_s6 = inlined_call_operand.vmem [shape: bf16[8,32], index: 6, kind: input, shape index: {}]   ;;  %s1305_s7 = inlined_call_operand.vmem [shape: f32[1,32], index: 7, kind: input, shape index: {}]   ;;  %s1306_s8 = inlined_call_operand.vmem [shape: bf16[32,16], index: 8, kind: input, shape index: {}]   ;;  %s1307_s9 = inlined_call_operand.vmem [shape: f32[1,16], index: 9, kind: input, shape index: {}]   ;;  %s1308_s10 = inlined_call_operand.vmem [shape: f32[32,8], index: 10, kind: input, shape index: {}]   ;;  %s1309_s11 = inlined_call_operand.hbm [shape: f32[32,128], index: 11, kind: output, shape index: {}]  }
   0x1   :  { %18 = vsyncpa [#allocation3 + $0x1], 0  ;;  %s1122_s17 = smov 0   ;;  %s1124_s18 = smov 0  }
   0x2   :  { %s1126_s19 = smov 0   ;;  %s1128_s20 = smov 0  }
   0x3 LB: > { %s1143_s21 = sadd.s32 4294967295, %s1052_s20   ;;  %s848_s22 = sadd.s32 4294967294, %s1052_s20   ;;  %s1052_s20 = sphi %s1128_s20, %s1315_s20   ;;  %s1048_s19 = sphi %s1126_s19, %s1314_s19   ;;  %s1044_s18 = sphi %s1124_s18, %s1313_s18   ;;  %s1040_s17 = sphi %s1122_s17, %s1312_s17  }
   0x4   : > { %s1147_s23 = sadd.s32 1, %s1052_s20   ;;  %s272_s24 = sadd.s32 1, %s1048_s19 }
   0x5   : > { %s269_s25 = ssub.s32 %s1052_s20, %s1147_s23  ;;  %p282_p0 = scmp.ne.s32.totalorder %s1048_s19, %s1044_s18 }
   0x6   : > { %p270_p1 = scmp.eq.s32.totalorder %s269_s25, 0  ;;  %p283_p2 = scmp.eq.s32.totalorder %s1143_s21, 1 }
   0x7   : > { %p288_p3 = scmp.ne.s32.totalorder %s1044_s18, %s1040_s17  ;;  %p289_p4 = scmp.eq.s32.totalorder %s848_s22, 1 }
   0x8   : > { %s1158_s26 = scalar_select %p270_p1, %s1048_s19, %s272_s24  }
   0x9   : > { %p1160_p5 = por %p283_p2, %p282_p0  ;;  %p1164_p6 = por %p289_p4, %p288_p3 }
   0xa   : > { %p851_p7 = scmp.ge.s32.totalorder %s1052_s20, 1  ;;  %p352_p8 = scmp.lt.s32.totalorder %s1052_s20, 3 }
   0xc   : > { %p353_p9 = pnand %p851_p7, %p352_p8 }
   0xd   : > { %v975_v0 = vld [vmem:[%s1300_s2] sm:$0xff] (!%p353_p9)   ;;  %v1054_v1 = vmov (!%p353_p9), 0.0   ;;  %s853_s12 = sshll.u32 (!%p353_p9), %s1143_s21, 1  ;;  %vm1055_vm0 = vmmov (!%p353_p9), 0   ;;  %v481_v3 = vld [vmem:[%s1302_s4 + $0x8] sm:$0xff] (!%p353_p9)  ;;  %vm433_vm1 = vcmask (!%p353_p9), 130048  }
   0xe   : > { %356 = sbr.rel (%p353_p9) target bundleno = 1084 (0x43c), region = 64  ;;  %890 = vmatprep.subr.bf16.mxu0 (!%p353_p9), %v1054_v1  ;;  %v480_v2 = vld [vmem:[%s1302_s4] sm:$0xff] (!%p353_p9)  ;;  %892 = vmatprep.mubr.msk.bf16.mxu0 (!%p353_p9), %vm1055_vm0, %v1054_v1  ;;  %p398_p10 = scmp.lt.s32.totalorder (!%p353_p9), %s853_s12, 3  ;;  %v414_v6 = vld [vmem:[%s1299_s1 + $0x8] sm:$0xff] (!%p353_p9)  ;;  %v482_v12 = vld [vmem:[%s1302_s4 + $0x10] sm:$0xff] (!%p353_p9)  ;;  %vm491_vm2 = vcmask (!%p353_p9), 261120  }
   0xf   : > { %891 = vmatpush3.bf16.msra.mxu0 (!%p353_p9), %v975_v0  ;;  %v921_v4 = vpack.c.bf16 (!%p353_p9), %v481_v3, %v480_v2  ;;  %v413_v5 = vld [vmem:[%s1299_s1] sm:$0xff] (!%p353_p9)  ;;  %v483_v13 = vld [vmem:[%s1302_s4 + $0x18] sm:$0xff] (!%p353_p9)  ;;  %s1056_s30 = smov (!%p353_p9), 16   ;;  %s1057_s24 = smov (!%p353_p9), 32   ;;  %vm606_vm3 = vcmask (!%p353_p9), 1043456   ;;  %vm602_vm4 = vcmask (!%p353_p9), 64512  }
  0x10   : > { %907 = vmatprep.subr.bf16.mxu0 (!%p353_p9), %v1054_v1  ;;  %v925_v14 = vpack.c.bf16 (!%p353_p9), %v483_v13, %v482_v12  ;;  %v857_v15 = vld [vmem:[%s1301_s3] ss:$0 sm:$0xff] (!%p353_p9)  ;;  %v977_v47 = vld [vmem:[%s1306_s8 + $0x8] sm:$0xff] (!%p353_p9)   ;;  %s394_s14 = sand.u32 (!%p353_p9), 1, %s1044_s18   ;;  %vm743_vm5 = vcmask (!%p353_p9), 261248   ;;  %vm754_vm6 = vcmask (!%p353_p9), 392448  }
  0x11   : > { %922 = vmatprep.subr.bf16.mxu1 (!%p353_p9), %v921_v4  ;;  %v860_v24 = vld [vmem:[%s1303_s5] ss:$0 sm:$0xff] (!%p353_p9)  ;;  %s876_s16 = sshll.u32 (!%p353_p9), %s1143_s21, 8  ;;  %vm757_vm7 = vcmask (!%p353_p9), 1047936   ;;  %s1257_s21 = scalar_lea.sflag (!%p353_p9), [#allocation3], %s394_s14 }
  0x12   : > { %924 = vmatpush3.bf16.msra.mxu1 (!%p353_p9), %v921_v4  ;;  %v594_v33 = vld [vmem:[%s1304_s6] sm:$0xf] (!%p353_p9)  ;;  %s1249_s29 = scalar_lea.hbm (!%p353_p9), %s1309_s11, %s876_s16  ;;  %s1059_s13 = smov (!%p353_p9), [#allocation2]  }
  0x13   : > { %926 = vmatprep.subr.bf16.mxu1 (!%p353_p9), %v925_v14  ;;  %v608_v34 = vsel (!%p353_p9), %vm606_vm3, %v594_v33, 0  ;;  %v976_v46 = vld [vmem:[%s1306_s8] sm:$0xff] (!%p353_p9)  }
  0x14   : > { %v863_v48 = vld [vmem:[%s1305_s7] ss:$0 sm:$0xff] (!%p353_p9) }
  0x15   : > { %s1317_s12 = smov (!%p398_p10, %s853_s12), 3  ;;  %v865_v58 = vld [vmem:[%s1307_s9] ss:$0 sm:$0xff] }
  0x16   : > { %s854_s22 = sshll.u32 %s1317_s12, 3  ;;  %928 = vmatpush3.bf16.msra.mxu1 %v925_v14 }
  0x17   : > { %s401_s15 = scalar_lea.vmem %s1298_s0, %s854_s22  ;;  %913 = vmatprep.subr.bf16.mxu1 %v1054_v1 }
  0x18   : > { %v411_v7 = vld [vmem:[%s401_s15] sm:$0xff]  ;;  %v412_v8 = vld [vmem:[%s401_s15 + $0x8] sm:$0xff]  ;;  %s407_s15 = scalar_lea.vmem %s1308_s10, %s854_s22 }
  0x19   : > { %v415_v9 = vmul.f32 %v413_v5, %v411_v7  ;;  %v416_v10 = vmul.f32 %v414_v6, %v412_v8  ;;  %v579_v37 = vld [vmem:[%s407_s15] sm:$0xff]  ;;  %v580_v39 = vld [vmem:[%s407_s15 + $0x8] sm:$0xff]  ;;  %s852_s15 = sshll.u32 %s394_s14, 4 }
  0x1a   : > { %s396_s25 = scalar_lea.vmem [#allocation2], %s852_s15  ;;  %s994_s15 = sshll.u32 %s1059_s13, 4  ;;  %s995_s15 = int_to_ptr.vmem [resolvable:$false] %s994_s15 }
  0x1b   : > { %v417_v11 = vpack.c.bf16 %v416_v10, %v415_v9  ;;  %737 = vrot.lane.b32.xlu1 %v415_v9, %s1056_s30  ;;  %s774_s12 = sshll.u32 %s396_s25, 4  ;;  %s996_s16 = scalar_lea.vmem %s995_s15, 512  ;;  %s1251_s12 = int_to_ptr.vmem [resolvable:$true] %s774_s12 }
  0x1c   : > { %p997_p0 = scmp.lt.s32.totalorder %s1251_s12, %s995_s15 }
  0x1d   : > { %893 = vmatmul.mubr.msk.bf16.vlgmr.msra.gmra.mrb[0].mxu0 %vm433_vm1, %v417_v11 }
  0x1e   : > { %909 = vmatprep.mubr.msk.bf16.mxu0 %vm1055_vm0, %v1054_v1  ;;  %908 = vmatpush3.bf16.msra.mxu0 %v608_v34 }
  0x1f   : > { %739 = vrot.lane.b32.xlu1 %v416_v10, %s1056_s30  ;;  %s1058_s30 = smov 120  }
  0x8d   : > { %v738_v8 = vpop.permute.xlu1 %737 }
  0x91   : > { %v740_v9 = vpop.permute.xlu1 %739 }
  0xf0   : > { %v471_v16 = vpop.f32.mrb[0].mxu0 }
  0xf1   : > { %v472_v17 = vadd.f32 %v857_v15, %v471_v16  ;;  %v894_v18 = vpop.f32.mrb[1].mxu0 }
  0xf2   : > { %v474_v19 = vpop.f32.mrb[2].mxu0 }
  0xf3   : > { %v478_v20 = vmax.f32 %v472_v17, 0.0  ;;  %v475_v21 = vadd.f32 %v857_v15, %v474_v19  ;;  %v895_v22 = vpop.f32.mrb[3].mxu0 }
  0xf5   : > { %v479_v23 = vmax.f32 %v475_v21, 0.0  ;;  %904 = vmatprep.mubr.msk.f32.mxu1 %vm491_vm2, %v478_v20 }
  0xf7   : > { %905 = vmatmul.mubr.msk.f32.vlgmr.msra.gmra.mrb[0].mxu1 %vm491_vm2, %v479_v23 }
  0xf8   : > { %917 = vmatprep.mubr.msk.bf16.mxu1 %vm1055_vm0, %v1054_v1  ;;  %914 = vmatpush3.bf16.msra.mxu1 %v976_v46 }
  0xf9   : > { %915 = vmatprep.subr.bf16.mxu1 %v1054_v1 }
  0xfc   : > { %916 = vmatpush3.bf16.msra.mxu1 %v977_v47 }
 0x1ca   : > { %v906_v25 = vpop.f32.mrb[0].mxu1 }
 0x1cb   : > { %v570_v26 = vadd.f32 %v906_v25, %v860_v24  ;;  %v564_v27 = vpop.f32.mrb[1].mxu1 }
 0x1cc   : > { %v565_v28 = vadd.f32 %v860_v24, %v564_v27 }
 0x1cd   : > { %750 = vrot.lane.b32.xlu1 %v570_v26, %s1057_s24  ;;  %v574_v29 = vmul.f32 0.5, %v570_v26 }
 0x1ce   : > { %v573_v30 = vmul.f32 0.5, %v565_v28 }
 0x1cf   : > { %v577_v32 = vmul.f32 1.442695, %v574_v29 }
 0x1d0   : > { %v575_v31 = vmul.f32 1.442695, %v573_v30 }
 0x1d2   : > { %978 = vpow2.f32 %v575_v31 }
 0x1d3   : > { %980 = vpow2.f32 %v577_v32 }
 0x1dc   : > { %v979_v35 = vpop.eup %978 }
 0x1dd   : > { %583 = vrot.lane.b32.xlu0 %v979_v35, %s1058_s30  ;;  %v981_v36 = vpop.eup %980 }
 0x1e1   : > { %585 = vrot.lane.b32.xlu0 %v981_v36, %s1058_s30  ;;  %s990_s30 = scalar_lea.vmem %s1251_s12, 256 }
 0x1e2   : > { %p991_p11 = scmp.ne.s32.totalorder %s1251_s12, %s990_s30  ;;  %p998_p1 = scmp.lt.s32.totalorder %s996_s16, %s990_s30 }
 0x1e4   : > { %p992_p12 = pnand %p991_p11, %p1160_p5  ;;  %p999_p2 = por %p998_p1, %p997_p0 }
 0x1e5   : > { %748 = vrot.lane.b32.xlu0 %v565_v28, %s1057_s24 }
 0x1e6   : > { %p993_p13 = pneg %p992_p12 }
 0x1e8   : > { %p1000_p3 = pnand %p999_p2, %p993_p13 }
 0x23f   : > { %v751_v13 = vpop.permute.xlu1 %750 }
 0x24f   : > { %v584_v38 = vpop.permute.xlu0 %583 }
 0x250   : > { %v589_v40 = vmul.f32 %v584_v38, %v579_v37 }
 0x252   : > { %v591_v43 = vadd.f32 %v589_v40, %v565_v28 }
 0x253   : > { %v586_v41 = vpop.permute.xlu0 %585 }
 0x254   : > { %v590_v42 = vmul.f32 %v586_v41, %v580_v39 }
 0x256   : > { %v592_v44 = vadd.f32 %v590_v42, %v570_v26 }
 0x257   : > { %v749_v12 = vpop.permute.xlu0 %748 }
 0x258   : > { %v593_v45 = vpack.c.bf16 %v592_v44, %v591_v43 }
 0x25a   : > { %910 = vmatmul.mubr.msk.bf16.vlgmr.msra.gmra.mrb[4].mxu0 %vm602_vm4, %v593_v45 }
 0x32d   : > { %v644_v49 = vpop.f32.mrb[4].mxu0 }
 0x32e   : > { %v645_v50 = vadd.f32 %v863_v48, %v644_v49  ;;  %v911_v51 = vpop.f32.mrb[5].mxu0 }
 0x32f   : > { %v647_v52 = vpop.f32.mrb[6].mxu0 }
 0x330   : > { %v648_v53 = vadd.f32 %v863_v48, %v647_v52  ;;  %v912_v54 = vpop.f32.mrb[7].mxu0  ;;  %v651_v55 = vmax.f32 %v645_v50, 0.0 }
 0x332   : > { %v652_v56 = vmax.f32 %v648_v53, 0.0 }
 0x334   : > { %v653_v57 = vpack.c.bf16 %v652_v56, %v651_v55 }
 0x336   : > { %918 = vmatmul.mubr.msk.bf16.vlgmr.msra.gmra.mrb[4].mxu1 %vm491_vm2, %v653_v57 }
 0x409   : > { %v714_v59 = vpop.f32.mrb[4].mxu1 }
 0x40a   : > { %v715_v60 = vadd.f32 %v865_v58, %v714_v59  ;;  %v919_v61 = vpop.f32.mrb[5].mxu1 }
 0x40b   : > { %v717_v62 = vpop.f32.mrb[6].mxu1 }
 0x40c   : > { %v869_v63 = vmul.f32 -1.442695, %v715_v60  ;;  %v718_v0 = vadd.f32 %v865_v58, %v717_v62  ;;  %v920_v2 = vpop.f32.mrb[7].mxu1 }
 0x40e   : > { %982 = vpow2.f32 %v869_v63  ;;  %v870_v3 = vmul.f32 -1.442695, %v718_v0 }
 0x410   : > { %984 = vpow2.f32 %v870_v3 }
 0x418   : > { %v983_v4 = vpop.eup %982 }
 0x419   : > { %v727_v5 = vadd.f32 1.0, %v983_v4 }
 0x41a   : > { %v985_v6 = vpop.eup %984 }
 0x41b   : > { %986 = vrcp.f32 %v727_v5  ;;  %v728_v7 = vadd.f32 1.0, %v985_v6 }
 0x41d   : > { %988 = vrcp.f32 %v728_v7 }
 0x425   : > { %v987_v10 = vpop.eup %986 }
 0x426   : > { %733 = vst.msk [vmem:[%s396_s25] sm:$0xff] %vm433_vm1, %v987_v10 }
 0x427   : > { %v989_v11 = vpop.eup %988  ;;  %744 = vst.msk [vmem:[%s396_s25] sm:$0xff] %vm743_vm5, %v738_v8 }
 0x428   : > { %734 = vst.msk [vmem:[%s396_s25 + $0x8] sm:$0xff] %vm433_vm1, %v989_v11 }
 0x429   : > { %755 = vst.msk [vmem:[%s396_s25] sm:$0xff] %vm754_vm6, %v749_v12 }
 0x42a   : > { %745 = vst.msk [vmem:[%s396_s25 + $0x8] sm:$0xff] %vm743_vm5, %v740_v9 }
 0x42b   : > { %758 = vst.msk [vmem:[%s396_s25] sm:$0xff] %vm757_vm7, %v1054_v1 }
 0x42c   : > { %756 = vst.msk [vmem:[%s396_s25 + $0x8] sm:$0xff] %vm754_vm6, %v751_v13 }
 0x42d   : > { %759 = vst.msk [vmem:[%s396_s25 + $0x8] sm:$0xff] %vm757_vm7, %v1054_v1 }
 0x42e   : > { %1003 = shalt.err (!%p1000_p3)
}
 0x42f   : > { %s1004_s14 = scalar_lea.hbm %s1249_s29, 256  ;;  %s1008_s24 = scalar_lea.hbm %s1309_s11, 512 }
 0x430   : > { %p1005_p4 = scmp.ne.s32.totalorder %s1249_s29, %s1004_s14  ;;  %p1009_p9 = scmp.lt.u32.totalorder %s1249_s29, %s1309_s11 }
 0x431   : > { %p1010_p10 = scmp.lt.u32.totalorder %s1008_s24, %s1004_s14  ;;  %p1012_p12 = scmp.lt.u32.totalorder %s1004_s14, %s1249_s29 }
 0x432   : > { %p1006_p7 = pnand %p1005_p4, %p1160_p5 }
 0x433   : > { %p1011_p11 = por %p1010_p10, %p1009_p9 }
 0x434   : > { %p1007_p8 = pneg %p1006_p7 }
 0x435   : > { %p1013_p13 = por %p1012_p12, %p1011_p11 }
 0x437   : > { %p1014_p0 = pnand %p1013_p13, %p1007_p8 }
 0x439   : > { %1017 = shalt.err (!%p1014_p0)
}
 0x43a   : > { %s1060_s30 = smov 128   ;;  %s1061_s16 = smov 8  }
 0x43b   : > { %929 = dma.vmem_to_hbm [thread:$0]  (%p1160_p5), %s1251_s12, 256, %s1249_s29, %s1257_s21, %s1060_s30, %s1060_s30, %s1061_s16  }
 0x43c PF: > { %p935_p1 = scmp.ge.s32.totalorder %s1052_s20, 2  ;;  %s789_s25 = sand.u32 1, %s1040_s17  }
 0x43d   : > { %s790_s14 = scalar_lea.sflag [#allocation3], %s789_s25 }
 0x43e   : > { %p932_p2 = pnand %p935_p1, %p1164_p6 }
 0x440   : > { %1035 = dma.done.wait (!%p932_p2), %s790_s14, 256  }
 0x441   : > { %1037 = vsyncadd (!%p932_p2), %s790_s14, 4294967040  ;;  %p21_p3 = scmp.ge.s32.totalorder %s1147_s23, 4   ;;  %s1312_s17 = smov %s1044_s18 }
 0x442   : > { %s1313_s18 = smov %s1048_s19  ;;  %s1314_s19 = smov %s1158_s26 }
 0x443   : > { %s1315_s20 = smov %s1147_s23  ;;  %23 = sbr.rel (!%p21_p3) target bundleno = 3 (0x3), region = 102 }
 0x44a   :  { %795 = vsyncpa [#allocation3], 1 }
 0x44b   :  { %797 = vsyncpa [#allocation3 + $0x1], 1 }

</bundles_post_ra>
